<compile_context>
chip_gen: v7x
topology: tpu7x:2x2x1
jax: 0.10.0
libtpu: 0.0.40
codegen_flags: <defaults>
</compile_context>

<pallas_src>
import jax
import jax.numpy as jnp
from jax import lax
from jax.experimental import pallas as pl
from jax.experimental.pallas import tpu as pltpu

EMB_DIM = 32
NUM_LAYER = 2
BN_EPS = 1e-5


def _round_up(x, m):
    return ((x + m - 1) // m) * m


# ----------------------------- Pallas kernel ------------------------------ #
def _gtam2d_gnn_kernel(src_ref, dst_ref, h0_ref, eemb_ref,
                       w1_ref, b1_ref, w2_ref, b2_ref, ope_ref,
                       out_ref, h_scr, aggr_scr):
    """Fused num_layer x (GINConv -> BatchNorm -> [ReLU]) forward.

    grid = (layer, edge_chunk). Node features h and the scatter accumulator are
    persistent VMEM scratch; the one-hot gather/scatter tiles are built in VMEM
    from the int32 edge indices (no [E, N] HBM traffic).
    """
    l = pl.program_id(0)
    e = pl.program_id(1)
    n_l = pl.num_programs(0)
    n_e = pl.num_programs(1)
    n_pad = h_scr.shape[0]
    e_blk = src_ref.shape[0]

    @pl.when(jnp.logical_and(l == 0, e == 0))
    def _():
        h_scr[...] = h0_ref[...]                      # load AtomEncoder output once

    @pl.when(e == 0)
    def _():
        aggr_scr[...] = jnp.zeros_like(aggr_scr)      # fresh scatter accumulator per layer

    # Build one-hot tiles in VMEM from the edge indices (padded edges carry index -1
    # -> all-zero row/column, i.e. they contribute nothing).
    src_ids = src_ref[...]                                               # [Eb, 1] i32
    dst_ids = dst_ref[...]                                               # [1, Eb] i32
    col_iota = lax.broadcasted_iota(jnp.int32, (e_blk, n_pad), 1)
    row_iota = lax.broadcasted_iota(jnp.int32, (n_pad, e_blk), 0)
    src_oh = (src_ids == col_iota).astype(jnp.bfloat16)                  # [Eb, N]
    dst_oh_t = (dst_ids == row_iota).astype(jnp.bfloat16)                # [N, Eb] (pre-transposed)

    # gather: x_j = h[edge_index[0]] via one-hot matmul on the MXU
    hb = h_scr[...].astype(jnp.bfloat16)
    xj = jnp.dot(src_oh, hb, preferred_element_type=jnp.float32)         # [Eb, D]
    # message: relu(x_j + bond_embedding)
    m = jnp.maximum(xj + eemb_ref[0], 0.0)                               # [Eb, D]
    # scatter-add at edge_index[1]: native-layout matmul, in-place accumulate
    aggr_scr[...] += jnp.dot(dst_oh_t, m.astype(jnp.bfloat16),
                             preferred_element_type=jnp.float32)         # [N, D]

    @pl.when(e == n_e - 1)
    def _():
        # GIN combine: (1 + eps) * h + aggr   ((1 + eps) scalar comes from SMEM)
        h0c = ope_ref[l] * h_scr[...] + aggr_scr[...]
        # MLP with BatchNorm folded into the Linear weights at init time:
        #   h1 = relu(h0c @ W1' + b1')   == Linear(D, 2D) -> BN(2D) -> ReLU
        h1 = jnp.maximum(
            jnp.dot(h0c.astype(jnp.bfloat16), w1_ref[0],
                    preferred_element_type=jnp.float32) + b1_ref[0], 0.0)    # [N, 2D]
        #   h2 = h1 @ W2' + b2'          == Linear(2D, D) -> outer BN(D)
        h2 = jnp.dot(h1.astype(jnp.bfloat16), w2_ref[0],
                     preferred_element_type=jnp.float32) + b2_ref[0]         # [N, D]
        # ReLU for all but the last layer; dropout(p=0, eval) == identity.
        h_new = jnp.where(l == n_l - 1, h2, jnp.maximum(h2, 0.0))
        h_scr[...] = h_new
        out_ref[...] = h_new   # constant out index_map -> single HBM writeback at grid end


def gtam_2d_gnn(h0, edge_emb, src_col, dst_row, w1, b1, w2, b2, one_plus_eps, *, e_blk):
    """Single fused pallas_call covering every GIN layer, tiled over edge chunks."""
    n_pad, d = h0.shape
    num_layer, e_pad, _ = edge_emb.shape
    d2 = w1.shape[-1]
    n_e = e_pad // e_blk
    grid = (num_layer, n_e)

    in_specs = [
        pl.BlockSpec((e_blk, 1), lambda li, ei: (ei, 0)),            # src indices  [E,1]
        pl.BlockSpec((1, e_blk), lambda li, ei: (0, ei)),            # dst indices  [1,E]
        pl.BlockSpec((n_pad, d), lambda li, ei: (0, 0)),             # h0 (resident)
        pl.BlockSpec((1, e_blk, d), lambda li, ei: (li, ei, 0)),     # bond embeddings
        pl.BlockSpec((1, d, d2), lambda li, ei: (li, 0, 0)),         # W1' (bf16)
        pl.BlockSpec((1, 1, d2), lambda li, ei: (li, 0, 0)),         # b1'
        pl.BlockSpec((1, d2, d), lambda li, ei: (li, 0, 0)),         # W2' (bf16)
        pl.BlockSpec((1, 1, d), lambda li, ei: (li, 0, 0)),          # b2'
        pl.BlockSpec(memory_space=pltpu.MemorySpace.SMEM),           # (1 + eps) per layer
    ]
    out_specs = pl.BlockSpec((n_pad, d), lambda li, ei: (0, 0))
    # TODO(synk): present the output as an [N/4, 128] lane-dense slab (minor win).
    return pl.pallas_call(
        _gtam2d_gnn_kernel,
        grid=grid,
        in_specs=in_specs,
        out_specs=out_specs,
        out_shape=jax.ShapeDtypeStruct((n_pad, d), jnp.float32),
        scratch_shapes=[pltpu.VMEM((n_pad, d), jnp.float32),   # h carried across layers
                        pltpu.VMEM((n_pad, d), jnp.float32)],  # scatter accumulator
        compiler_params=pltpu.CompilerParams(
            dimension_semantics=("arbitrary", "arbitrary"),
            vmem_limit_bytes=48 * 1024 * 1024),
    )(src_col, dst_row, h0, edge_emb, w1, b1, w2, b2, one_plus_eps)


# ------------------------------ JAX glue ---------------------------------- #
def embed_sum(tables, idx):
    """OGB-style encoder: sum of per-feature embedding lookups."""
    out = jnp.zeros((idx.shape[0], tables[0].shape[1]), jnp.float32)
    for f, tab in enumerate(tables):
        out = out + jnp.take(tab, idx[:, f], axis=0)
    return out


def init_params(key, emb_dim=EMB_DIM, num_layer=NUM_LAYER,
                atom_vocab=(16, 8), bond_vocab=(8, 4)):
    keys = iter(jax.random.split(key, 128))
    params = {"atom_emb": [jax.random.normal(next(keys), (v, emb_dim), jnp.float32) * 0.1
                           for v in atom_vocab]}
    layers = []
    for _ in range(num_layer):
        lp = {}
        lp["bond_emb"] = [jax.random.normal(next(keys), (v, emb_dim), jnp.float32) * 0.1
                          for v in bond_vocab]
        w1 = (jax.random.normal(next(keys), (emb_dim, 2 * emb_dim), jnp.float32)
              / jnp.sqrt(jnp.float32(emb_dim)))
        b1 = jnp.zeros((1, 2 * emb_dim), jnp.float32)
        # BatchNorm1d(2*emb_dim), eval mode, fresh running stats
        s1 = jnp.ones((1, 2 * emb_dim)) / jnp.sqrt(jnp.ones((1, 2 * emb_dim)) + BN_EPS)
        t1 = jnp.zeros((1, 2 * emb_dim))
        w2 = (jax.random.normal(next(keys), (2 * emb_dim, emb_dim), jnp.float32)
              / jnp.sqrt(jnp.float32(2 * emb_dim)))
        b2 = jnp.zeros((1, emb_dim), jnp.float32)
        # outer BatchNorm1d(emb_dim), eval mode, fresh running stats
        s = jnp.ones((1, emb_dim)) / jnp.sqrt(jnp.ones((1, emb_dim)) + BN_EPS)
        t = jnp.zeros((1, emb_dim))
        # One-time fold of the BN affines into the Linear weights/biases:
        #   BN(x @ W + b) == x @ (W * s) + (b * s + t)
        lp["w1"] = (w1 * s1).astype(jnp.bfloat16)   # [D, 2D]  bf16 MXU operand
        lp["b1"] = b1 * s1 + t1                     # [1, 2D]  f32
        lp["w2"] = (w2 * s).astype(jnp.bfloat16)    # [2D, D]  bf16 MXU operand
        lp["b2"] = b2 * s + t                       # [1, D]   f32
        lp["eps"] = jnp.zeros((), jnp.float32)      # GIN eps parameter (init 0)
        layers.append(lp)
    params["layers"] = layers
    return params


def gtam_2d_forward(params, x_int, edge_index, edge_attr_int, *, e_blk=256):
    """GTAM_2D.forward with evo_config=None, JK='last', drop_ratio=0 (eval)."""
    n = x_int.shape[0]
    e = edge_index.shape[1]
    layers = params["layers"]

    n_pad = max(_round_up(n, 8), 8)
    e_pad = max(_round_up(e, e_blk), e_blk)

    h0 = embed_sum(params["atom_emb"], x_int)                              # AtomEncoder
    h0 = jnp.pad(h0, ((0, n_pad - n), (0, 0)))

    # Connectivity stays as int32 indices (O(E) bytes); padded edges -> index -1,
    # which the in-kernel iota compare turns into an all-zero one-hot row/column.
    src = jnp.pad(edge_index[0].astype(jnp.int32), (0, e_pad - e), constant_values=-1)
    dst = jnp.pad(edge_index[1].astype(jnp.int32), (0, e_pad - e), constant_values=-1)
    src_col = src.reshape(e_pad, 1)
    dst_row = dst.reshape(1, e_pad)

    # Per-layer BondEncoder1 embeddings + stacked fused weights so one pallas_call
    # covers every layer with the weights resident in VMEM.
    edge_emb = jnp.stack([
        jnp.pad(embed_sum(lp["bond_emb"], edge_attr_int), ((0, e_pad - e), (0, 0)))
        for lp in layers])                                                 # [L, E, D]
    w1 = jnp.stack([lp["w1"] for lp in layers])                            # [L, D, 2D]
    b1 = jnp.stack([lp["b1"] for lp in layers])                            # [L, 1, 2D]
    w2 = jnp.stack([lp["w2"] for lp in layers])                            # [L, 2D, D]
    b2 = jnp.stack([lp["b2"] for lp in layers])                            # [L, 1, D]
    one_plus_eps = jnp.stack([1.0 + lp["eps"] for lp in layers])           # [L]

    h = gtam_2d_gnn(h0, edge_emb, src_col, dst_row, w1, b1, w2, b2,
                    one_plus_eps, e_blk=e_blk)
    # JK == 'last' -> node_representation = h_list[-1]; evo_config is None.
    return h[:n], None, None


def reference_forward(params, x_int, edge_index, edge_attr_int):
    """Pure-JAX (f32, scatter-based) reference for correctness checking."""
    h = embed_sum(params["atom_emb"], x_int)
    src, dst = edge_index[0], edge_index[1]
    layers = params["layers"]
    num_layer = len(layers)
    for l, lp in enumerate(layers):
        eemb = embed_sum(lp["bond_emb"], edge_attr_int)
        m = jnp.maximum(h[src] + eemb, 0.0)
        aggr = jnp.zeros_like(h).at[dst].add(m)
        h0 = (1.0 + lp["eps"]) * h + aggr
        h1 = jnp.maximum(h0 @ lp["w1"].astype(jnp.float32) + lp["b1"], 0.0)
        h2 = h1 @ lp["w2"].astype(jnp.float32) + lp["b2"]
        if l != num_layer - 1:
            h2 = jnp.maximum(h2, 0.0)
        h = h2
    return h


# -------------------------------- main ------------------------------------ #
if __name__ == "__main__":
    key = jax.random.PRNGKey(0)
    k_node, k_eattr, k_src, k_dst = jax.random.split(key, 4)

    N, E = 48, 320                                           # 2 edge chunks at E_BLK=256
    x_int = jax.random.randint(k_node, (N, 2), 0, 8)         # integer atom features
    edge_attr = jax.random.randint(k_eattr, (E, 2), 0, 4)    # integer bond features
    src = jax.random.randint(k_src, (E,), 0, N)
    dst = jax.random.randint(k_dst, (E,), 0, N)
    edge_index = jnp.stack([src, dst], axis=0)               # [2, E]

    params = init_params(jax.random.PRNGKey(0))

    node_rep, zij, pair_mask = gtam_2d_forward(params, x_int, edge_index, edge_attr,
                                               e_blk=256)
    node_rep = jax.block_until_ready(node_rep)

    assert node_rep.shape == (N, EMB_DIM)
    assert node_rep.dtype == jnp.float32
    assert bool(jnp.all(jnp.isfinite(node_rep)))
    assert zij is None and pair_mask is None

    ref = reference_forward(params, x_int, edge_index, edge_attr)
    assert bool(jnp.allclose(node_rep, ref, atol=5e-2, rtol=5e-2)), (
        "max abs err %f" % float(jnp.max(jnp.abs(node_rep - ref))))
    print("KERNEL_OK")
</pallas_src>

<mosaic_0001>
module attributes {stable_mosaic.version = 11 : i64} {
  func.func @_gtam2d_gnn_kernel(%arg0: i32, %arg1: i32, %arg2: memref<256x1xi32, #tpu.memory_space<vmem>>, %arg3: memref<1x256xi32, #tpu.memory_space<vmem>>, %arg4: memref<48x32xf32, #tpu.memory_space<vmem>>, %arg5: memref<1x256x32xf32, #tpu.memory_space<vmem>>, %arg6: memref<1x32x64xbf16, #tpu.memory_space<vmem>>, %arg7: memref<1x1x64xf32, #tpu.memory_space<vmem>>, %arg8: memref<1x64x32xbf16, #tpu.memory_space<vmem>>, %arg9: memref<1x1x32xf32, #tpu.memory_space<vmem>>, %arg10: memref<2xf32, #tpu.memory_space<smem>>, %arg11: memref<48x32xf32, #tpu.memory_space<vmem>>, %arg12: memref<48x32xf32, #tpu.memory_space<vmem>>, %arg13: memref<48x32xf32, #tpu.memory_space<vmem>>) attributes {dimension_semantics = [#tpu.dimension_semantics<arbitrary>, #tpu.dimension_semantics<arbitrary>], iteration_bounds = array<i64: 2, 2>, scalar_prefetch = 0 : i64, scratch_operands = 2 : i64, tpu.core_type = #tpu.core_type<tc>, window_params = [{transform_indices = @transform_0, window_bounds = array<i64: 256, 1>}, {transform_indices = @transform_1, window_bounds = array<i64: 1, 256>}, {pipeline_mode = #tpu.pipeline_mode<synchronous>, transform_indices = @transform_2, window_bounds = array<i64: 48, 32>}, {transform_indices = @transform_3, window_bounds = array<i64: 1, 256, 32>}, {transform_indices = @transform_4, window_bounds = array<i64: 1, 32, 64>}, {transform_indices = @transform_5, window_bounds = array<i64: 1, 1, 64>}, {transform_indices = @transform_6, window_bounds = array<i64: 1, 64, 32>}, {transform_indices = @transform_7, window_bounds = array<i64: 1, 1, 32>}, {transform_indices = @transform_8, window_bounds = array<i64: 2>}, {pipeline_mode = #tpu.pipeline_mode<synchronous>, transform_indices = @transform_9, window_bounds = array<i64: 48, 32>}]} {
    %c0_i32 = arith.constant 0 : i32
    %0 = arith.cmpi eq, %arg0, %c0_i32 : i32
    %c0_i32_0 = arith.constant 0 : i32
    %1 = arith.cmpi eq, %arg1, %c0_i32_0 : i32
    %2 = arith.andi %0, %1 : i1
    %3 = arith.extui %2 : i1 to i32
    %c0_i32_1 = arith.constant 0 : i32
    %4 = arith.cmpi ne, %3, %c0_i32_1 : i32
    scf.if %4 {
      %c0_19 = arith.constant 0 : index
      %c0_20 = arith.constant 0 : index
      %38 = vector.load %arg4[%c0_19, %c0_20] : memref<48x32xf32, #tpu.memory_space<vmem>>, vector<48x32xf32>
      %c0_21 = arith.constant 0 : index
      %c0_22 = arith.constant 0 : index
      %39 = vector.load %arg12[%c0_21, %c0_22] : memref<48x32xf32, #tpu.memory_space<vmem>>, vector<48x32xf32>
      tpu.vector_store %arg12[%c0_21, %c0_22], %38 {strides = array<i32>} : memref<48x32xf32, #tpu.memory_space<vmem>>, vector<48x32xf32>,
    } else {
    }
    %c0_i32_2 = arith.constant 0 : i32
    %5 = arith.cmpi eq, %arg1, %c0_i32_2 : i32
    %6 = arith.extui %5 : i1 to i32
    %c0_i32_3 = arith.constant 0 : i32
    %7 = arith.cmpi ne, %6, %c0_i32_3 : i32
    scf.if %7 {
      %cst_19 = arith.constant 0.000000e+00 : f32
      %38 = vector.broadcast %cst_19 : f32 to vector<48x32xf32>
      %c0_20 = arith.constant 0 : index
      %c0_21 = arith.constant 0 : index
      %39 = vector.load %arg13[%c0_20, %c0_21] : memref<48x32xf32, #tpu.memory_space<vmem>>, vector<48x32xf32>
      tpu.vector_store %arg13[%c0_20, %c0_21], %38 {strides = array<i32>} : memref<48x32xf32, #tpu.memory_space<vmem>>, vector<48x32xf32>,
    } else {
    }
    %c0 = arith.constant 0 : index
    %c0_4 = arith.constant 0 : index
    %8 = vector.load %arg2[%c0, %c0_4] : memref<256x1xi32, #tpu.memory_space<vmem>>, vector<256x1xi32>
    %c0_5 = arith.constant 0 : index
    %c0_6 = arith.constant 0 : index
    %9 = vector.load %arg3[%c0_5, %c0_6] : memref<1x256xi32, #tpu.memory_space<vmem>>, vector<1x256xi32>
    %10 = tpu.iota {dimensions = array<i32: 1>} : vector<256x48xi32>
    %11 = tpu.iota {dimensions = array<i32: 0>} : vector<48x256xi32>
    %12 = vector.broadcast %8 : vector<256x1xi32> to vector<256x48xi32>
    %13 = arith.cmpi eq, %12, %10 : vector<256x48xi32>
    %14 = arith.extui %13 : vector<256x48xi1> to vector<256x48xi32>
    %15 = arith.sitofp %14 : vector<256x48xi32> to vector<256x48xf32>
    %16 = arith.truncf %15 : vector<256x48xf32> to vector<256x48xbf16>
    %17 = vector.broadcast %9 : vector<1x256xi32> to vector<48x256xi32>
    %18 = arith.cmpi eq, %17, %11 : vector<48x256xi32>
    %19 = arith.extui %18 : vector<48x256xi1> to vector<48x256xi32>
    %20 = arith.sitofp %19 : vector<48x256xi32> to vector<48x256xf32>
    %21 = arith.truncf %20 : vector<48x256xf32> to vector<48x256xbf16>
    %c0_7 = arith.constant 0 : index
    %c0_8 = arith.constant 0 : index
    %22 = vector.load %arg12[%c0_7, %c0_8] : memref<48x32xf32, #tpu.memory_space<vmem>>, vector<48x32xf32>
    %23 = arith.truncf %22 : vector<48x32xf32> to vector<48x32xbf16>
    %cst = arith.constant dense<0.000000e+00> : vector<256x32xf32>
    %24 = tpu.matmul %16, %23, %cst {dimension_numbers = #tpu.dot_dimension_numbers<[1], [0], [0], [1], [0, 0, 1, 1], [], []>} : vector<256x48xbf16>, vector<48x32xbf16>, vector<256x32xf32> -> vector<256x32xf32>
    %c0_9 = arith.constant 0 : index
    %c0_10 = arith.constant 0 : index
    %c0_11 = arith.constant 0 : index
    %25 = vector.load %arg5[%c0_9, %c0_10, %c0_11] : memref<1x256x32xf32, #tpu.memory_space<vmem>>, vector<1x256x32xf32>
    %26 = vector.shape_cast %25 : vector<1x256x32xf32> to vector<256x32xf32>
    %27 = arith.addf %24, %26 : vector<256x32xf32>
    %cst_12 = arith.constant 0.000000e+00 : f32
    %28 = vector.broadcast %cst_12 : f32 to vector<256x32xf32>
    %29 = arith.maximumf %27, %28 : vector<256x32xf32>
    %c0_13 = arith.constant 0 : index
    %c0_14 = arith.constant 0 : index
    %30 = vector.load %arg13[%c0_13, %c0_14] : memref<48x32xf32, #tpu.memory_space<vmem>>, vector<48x32xf32>
    %31 = arith.truncf %29 : vector<256x32xf32> to vector<256x32xbf16>
    %cst_15 = arith.constant dense<0.000000e+00> : vector<48x32xf32>
    %32 = tpu.matmul %21, %31, %cst_15 {dimension_numbers = #tpu.dot_dimension_numbers<[1], [0], [0], [1], [0, 0, 1, 1], [], []>} : vector<48x256xbf16>, vector<256x32xbf16>, vector<48x32xf32> -> vector<48x32xf32>
    %33 = arith.addf %30, %32 : vector<48x32xf32>
    %c0_16 = arith.constant 0 : index
    %c0_17 = arith.constant 0 : index
    %34 = vector.load %arg13[%c0_16, %c0_17] : memref<48x32xf32, #tpu.memory_space<vmem>>, vector<48x32xf32>
    tpu.vector_store %arg13[%c0_16, %c0_17], %33 {strides = array<i32>} : memref<48x32xf32, #tpu.memory_space<vmem>>, vector<48x32xf32>,
    %c1_i32 = arith.constant 1 : i32
    %35 = arith.cmpi eq, %arg1, %c1_i32 : i32
    %36 = arith.extui %35 : i1 to i32
    %c0_i32_18 = arith.constant 0 : i32
    %37 = arith.cmpi ne, %36, %c0_i32_18 : i32
    scf.if %37 {
      %38 = arith.index_cast %arg0 : i32 to index
      %39 = memref.load %arg10[%38] : memref<2xf32, #tpu.memory_space<smem>>
      %c0_19 = arith.constant 0 : index
      %c0_20 = arith.constant 0 : index
      %40 = vector.load %arg12[%c0_19, %c0_20] : memref<48x32xf32, #tpu.memory_space<vmem>>, vector<48x32xf32>
      %41 = vector.broadcast %39 : f32 to vector<48x32xf32>
      %42 = arith.mulf %41, %40 : vector<48x32xf32>
      %c0_21 = arith.constant 0 : index
      %c0_22 = arith.constant 0 : index
      %43 = vector.load %arg13[%c0_21, %c0_22] : memref<48x32xf32, #tpu.memory_space<vmem>>, vector<48x32xf32>
      %44 = arith.addf %42, %43 : vector<48x32xf32>
      %45 = arith.truncf %44 : vector<48x32xf32> to vector<48x32xbf16>
      %c0_23 = arith.constant 0 : index
      %c0_24 = arith.constant 0 : index
      %c0_25 = arith.constant 0 : index
      %46 = vector.load %arg6[%c0_23, %c0_24, %c0_25] : memref<1x32x64xbf16, #tpu.memory_space<vmem>>, vector<1x32x64xbf16>
      %47 = vector.shape_cast %46 : vector<1x32x64xbf16> to vector<32x64xbf16>
      %cst_26 = arith.constant dense<0.000000e+00> : vector<48x64xf32>
      %48 = tpu.matmul %45, %47, %cst_26 {dimension_numbers = #tpu.dot_dimension_numbers<[1], [0], [0], [1], [0, 0, 1, 1], [], []>} : vector<48x32xbf16>, vector<32x64xbf16>, vector<48x64xf32> -> vector<48x64xf32>
      %c0_27 = arith.constant 0 : index
      %c0_28 = arith.constant 0 : index
      %c0_29 = arith.constant 0 : index
      %49 = vector.load %arg7[%c0_27, %c0_28, %c0_29] : memref<1x1x64xf32, #tpu.memory_space<vmem>>, vector<1x1x64xf32>
      %50 = vector.shape_cast %49 : vector<1x1x64xf32> to vector<1x64xf32>
      %51 = vector.broadcast %50 : vector<1x64xf32> to vector<48x64xf32>
      %52 = arith.addf %48, %51 : vector<48x64xf32>
      %cst_30 = arith.constant 0.000000e+00 : f32
      %53 = vector.broadcast %cst_30 : f32 to vector<48x64xf32>
      %54 = arith.maximumf %52, %53 : vector<48x64xf32>
      %55 = arith.truncf %54 : vector<48x64xf32> to vector<48x64xbf16>
      %c0_31 = arith.constant 0 : index
      %c0_32 = arith.constant 0 : index
      %c0_33 = arith.constant 0 : index
      %56 = vector.load %arg8[%c0_31, %c0_32, %c0_33] : memref<1x64x32xbf16, #tpu.memory_space<vmem>>, vector<1x64x32xbf16>
      %57 = vector.shape_cast %56 : vector<1x64x32xbf16> to vector<64x32xbf16>
      %cst_34 = arith.constant dense<0.000000e+00> : vector<48x32xf32>
      %58 = tpu.matmul %55, %57, %cst_34 {dimension_numbers = #tpu.dot_dimension_numbers<[1], [0], [0], [1], [0, 0, 1, 1], [], []>} : vector<48x64xbf16>, vector<64x32xbf16>, vector<48x32xf32> -> vector<48x32xf32>
      %c0_35 = arith.constant 0 : index
      %c0_36 = arith.constant 0 : index
      %c0_37 = arith.constant 0 : index
      %59 = vector.load %arg9[%c0_35, %c0_36, %c0_37] : memref<1x1x32xf32, #tpu.memory_space<vmem>>, vector<1x1x32xf32>
      %60 = vector.shape_cast %59 : vector<1x1x32xf32> to vector<1x32xf32>
      %61 = vector.broadcast %60 : vector<1x32xf32> to vector<48x32xf32>
      %62 = arith.addf %58, %61 : vector<48x32xf32>
      %c1_i32_38 = arith.constant 1 : i32
      %63 = arith.cmpi eq, %arg0, %c1_i32_38 : i32
      %cst_39 = arith.constant 0.000000e+00 : f32
      %64 = vector.broadcast %cst_39 : f32 to vector<48x32xf32>
      %65 = arith.maximumf %62, %64 : vector<48x32xf32>
      %66 = arith.select %63, %62, %65 : vector<48x32xf32>
      %c0_40 = arith.constant 0 : index
      %c0_41 = arith.constant 0 : index
      %67 = vector.load %arg12[%c0_40, %c0_41] : memref<48x32xf32, #tpu.memory_space<vmem>>, vector<48x32xf32>
      tpu.vector_store %arg12[%c0_40, %c0_41], %66 {strides = array<i32>} : memref<48x32xf32, #tpu.memory_space<vmem>>, vector<48x32xf32>,
      %c0_42 = arith.constant 0 : index
      %c0_43 = arith.constant 0 : index
      %68 = vector.load %arg11[%c0_42, %c0_43] : memref<48x32xf32, #tpu.memory_space<vmem>>, vector<48x32xf32>
      tpu.vector_store %arg11[%c0_42, %c0_43], %66 {strides = array<i32>} : memref<48x32xf32, #tpu.memory_space<vmem>>, vector<48x32xf32>,
    } else {
    }
    return
  }
  func.func @transform_0(%arg0: i32, %arg1: i32) -> (i32, i32) {
    %c0_i32 = arith.constant 0 : i32
    %c0_i32_0 = arith.constant 0 : i32
    return %arg1, %c0_i32 : i32, i32
  }
  func.func @transform_1(%arg0: i32, %arg1: i32) -> (i32, i32) {
    %c0_i32 = arith.constant 0 : i32
    %c0_i32_0 = arith.constant 0 : i32
    return %c0_i32, %arg1 : i32, i32
  }
  func.func @transform_2(%arg0: i32, %arg1: i32) -> (i32, i32) {
    %c0_i32 = arith.constant 0 : i32
    %c0_i32_0 = arith.constant 0 : i32
    %c0_i32_1 = arith.constant 0 : i32
    return %c0_i32, %c0_i32_0 : i32, i32
  }
  func.func @transform_3(%arg0: i32, %arg1: i32) -> (i32, i32, i32) {
    %c0_i32 = arith.constant 0 : i32
    %c0_i32_0 = arith.constant 0 : i32
    return %arg0, %arg1, %c0_i32 : i32, i32, i32
  }
  func.func @transform_4(%arg0: i32, %arg1: i32) -> (i32, i32, i32) {
    %c0_i32 = arith.constant 0 : i32
    %c0_i32_0 = arith.constant 0 : i32
    %c0_i32_1 = arith.constant 0 : i32
    return %arg0, %c0_i32, %c0_i32_0 : i32, i32, i32
  }
  func.func @transform_5(%arg0: i32, %arg1: i32) -> (i32, i32, i32) {
    %c0_i32 = arith.constant 0 : i32
    %c0_i32_0 = arith.constant 0 : i32
    %c0_i32_1 = arith.constant 0 : i32
    return %arg0, %c0_i32, %c0_i32_0 : i32, i32, i32
  }
  func.func @transform_6(%arg0: i32, %arg1: i32) -> (i32, i32, i32) {
    %c0_i32 = arith.constant 0 : i32
    %c0_i32_0 = arith.constant 0 : i32
    %c0_i32_1 = arith.constant 0 : i32
    return %arg0, %c0_i32, %c0_i32_0 : i32, i32, i32
  }
  func.func @transform_7(%arg0: i32, %arg1: i32) -> (i32, i32, i32) {
    %c0_i32 = arith.constant 0 : i32
    %c0_i32_0 = arith.constant 0 : i32
    %c0_i32_1 = arith.constant 0 : i32
    return %arg0, %c0_i32, %c0_i32_0 : i32, i32, i32
  }
  func.func @transform_8(%arg0: i32, %arg1: i32) -> i32 {
    %c0_i32 = arith.constant 0 : i32
    %c0_i32_0 = arith.constant 0 : i32
    return %c0_i32 : i32
  }
  func.func @transform_9(%arg0: i32, %arg1: i32) -> (i32, i32) {
    %c0_i32 = arith.constant 0 : i32
    %c0_i32_0 = arith.constant 0 : i32
    %c0_i32_1 = arith.constant 0 : i32
    return %c0_i32, %c0_i32_0 : i32, i32
  }
}

</mosaic_0001>

<bundles_post_ra>
// kernel: tpu_custom_call.1
= control target key start
LH: loop header
LB: loop body
LE: loop exit
PB: predicated region body
PF: predicated region fallthrough
CT: control target
= control target key end

     0   :  { %s2431_s0 = inlined_call_operand.vmem [shape: s32[512,1], index: 0, kind: input, shape index: {}]   ;;  %s2432_s1 = inlined_call_operand.vmem [shape: s32[1,512], index: 1, kind: input, shape index: {}]   ;;  %s2433_s2 = inlined_call_operand.vmem [shape: f32[48,32], index: 2, kind: input, shape index: {}]   ;;  %s2434_s3 = inlined_call_operand.vmem [shape: f32[2,512,32], index: 3, kind: input, shape index: {}]   ;;  %s2435_s4 = inlined_call_operand.vmem [shape: bf16[2,32,64], index: 4, kind: input, shape index: {}]   ;;  %s2436_s5 = inlined_call_operand.vmem [shape: f32[2,1,64], index: 5, kind: input, shape index: {}]   ;;  %s2437_s6 = inlined_call_operand.vmem [shape: bf16[2,64,32], index: 6, kind: input, shape index: {}]   ;;  %s2438_s7 = inlined_call_operand.vmem [shape: f32[2,1,32], index: 7, kind: input, shape index: {}]   ;;  %s2439_s8 = inlined_call_operand.vmem [shape: f32[2], index: 8, kind: input, shape index: {}]   ;;  %s2440_s9 = inlined_call_operand.vmem [shape: f32[48,32], index: 9, kind: output, shape index: {}]  }
   0x1   :  { %2443 = sst [smem:[#allocation11_spill]] %s2431_s0 }
   0x2   :  { %2444 = sst [smem:[#allocation12_spill]] %s2439_s8 }
   0x3   :  { %14 = vsyncpa [#allocation5], 0  ;;  %s1988_s30 = smov 0   ;;  %s1990_s10 = smov 0  }
   0x4   :  { %s1992_s11 = smov 0   ;;  %s1994_s12 = smov 0  }
   0x5   :  { %s1996_s13 = smov 0  }
   0x6 LB: > { %2445 = sst [smem:[#allocation7_spill]] %s1921_s11  ;;  %s1560_s14 = sadd.s32 4294967295, %s1929_s13   ;;  %s1929_s13 = sphi %s1996_s13, %s20_s13   ;;  %s1925_s12 = sphi %s1994_s12, %s2469_s12   ;;  %s1921_s11 = sphi %s1992_s11, %s2468_s11   ;;  %s1917_s10 = sphi %s1990_s10, %s2467_s10   ;;  %s1913_s30 = sphi %s1988_s30, %s2466_s30  }
   0x7   : > { %2446 = sst [smem:[#allocation8_spill]] %s1925_s12  ;;  %s29_s15 = sadd.s32 1, %s1921_s11 }
   0x8   : > { %p30_p0 = scmp.ge.s32.totalorder %s29_s15, 2  ;;  %s32_s16 = sadd.s32 1, %s1925_s12 }
   0x9   : > { %p1561_p1 = scmp.ge.s32.totalorder %s1929_s13, 1  ;;  %p284_p2 = scmp.lt.s32.totalorder %s1929_s13, 5 }
   0xa   : > { %s2471_s15 = smov (%p30_p0, %s29_s15), 0  ;;  %s2473_s16 = smov (!%p30_p0, %s32_s16), %s1925_s12 }
   0xb   : > { %2447 = sst [smem:[#allocation9_spill]] %s2471_s15  ;;  %p2021_p3 = pnand %p1561_p1, %p284_p2 }
   0xc   : > { %p34_p4 = scmp.ge.s32.totalorder %s2473_s16, 2  ;;  %p2025_p5 = scmp.eq.s32.totalorder %s1560_s14, 0 }
   0xd   : > { %p1811_p6 = pneg %p2021_p3  ;;  %s2450_s8 = sld [smem:[#allocation12_spill]] }
   0xe   : > { %s2475_s16 = smov (%p34_p4, %s2473_s16), 0 }
   0xf   : > { %2451 = sst [smem:[#allocation10_spill]] %s2475_s16  ;;  %p1812_p7 = pnand %p2025_p5, %p1811_p6 }
  0x11   : > { %p1874_p9 = pneg %p1812_p7 }
  0x13   : > { %s300_s21 = sshll.u32 %s2450_s8, 4  ;;  %s301_s21 = int_to_ptr.vmem [resolvable:$true] %s300_s21 }
  0x14   : > { %s1872_s22 = scalar_lea.vmem %s301_s21, 16  ;;  %p1880_p12 = scmp.lt.s32.totalorder %s301_s21, %s301_s21 }
  0x15   : > { %p1873_p8 = scmp.ne.s32.totalorder %s301_s21, %s1872_s22  ;;  %p1881_p13 = scmp.lt.s32.totalorder %s1872_s22, %s1872_s22 }
  0x17   : > { %p1875_p10 = pnand %p1874_p9, %p1873_p8  ;;  %p1882_p0 = por %p1881_p13, %p1880_p12 }
  0x19   : > { %p1876_p11 = pneg %p1875_p10 }
  0x1b   : > { %p1883_p1 = pnand %p1882_p0, %p1876_p11 }
  0x1d   : > { %1886 = shalt.err (!%p1883_p1)
}
  0x1e   : > { %s1931_s23 = smov [#allocation4]   ;;  %371 = sbr.rel (%p2021_p3) target bundleno = 1180 (0x49c), region = 56 }
  0x1f   : > { %1814 = dma.vmem_to_smem (!%p1812_p7), %s301_s21, 16, %s1931_s23, [#allocation5]  }
  0x25   : > { %1908 = dma.done.wait (%p2025_p5), [#allocation5], 16  }
  0x26   : > { %1910 = vsyncadd (%p2025_p5), [#allocation5], 4294967280 }
  0x27   : > { %377 = sfence }
  0x28   : > { %s1566_s24 = sshll.u32 %s1913_s30, 5  ;;  %s1568_s25 = sshll.u32 %s1913_s30, 1 }
  0x29   : > { %p433_p2 = scmp.lt.s32.totalorder %s1566_s24, 63  ;;  %p439_p4 = scmp.lt.s32.totalorder %s1568_s25, 3 }
  0x2a   : > { %p444_p6 = scmp.lt.s32.totalorder %s1917_s10, 1  ;;  %p470_p7 = scmp.eq.s32.totalorder %s1917_s10, 0 }
  0x2b   : > { %s2477_s24 = smov (!%p433_p2, %s1566_s24), 63  ;;  %s2479_s25 = smov (!%p439_p4, %s1568_s25), 3 }
  0x2c   : > { %s1567_s26 = sshll.u32 %s2477_s24, 3  ;;  %p471_p3 = scmp.eq.s32.totalorder %s1913_s30, 0 }
  0x2d   : > { %s2452_s0 = sld [smem:[#allocation11_spill]] }
  0x2e   : > { %s2061_s19 = scalar_select %p444_p6, %s1917_s10, 1 }
  0x2f   : > { %p472_p5 = pnand %p471_p3, %p470_p7 }
  0x30   : > { %s1570_s20 = sshll.u32 %s2061_s19, 6  ;;  %s1666_s21 = sshll.u32 %s2061_s19, 4  ;;  %v476_v0 = vld [vmem:[%s2433_s2] sm:$0xff] (!%p472_p5)  ;;  %vm482_vm0 = vcmask (!%p472_p5), 261120   ;;  %v477_v1 = vld [vmem:[%s2433_s2 + $0x8] sm:$0xff] (!%p472_p5)  ;;  %v478_v2 = vld [vmem:[%s2433_s2 + $0x10] sm:$0xff] (!%p472_p5) }
  0x31   : > { %s449_s22 = sadd.s32 %s1570_s20, %s2477_s24  ;;  %s460_s17 = scalar_lea.vmem %s2436_s5, %s2061_s19  ;;  %483 = vst.msk [vmem:[#allocation2] sm:$0xff] (!%p472_p5), %vm482_vm0, %v476_v0  ;;  %484 = vst.msk [vmem:[#allocation2 + $0x8] sm:$0xff] (!%p472_p5), %vm482_vm0, %v477_v1  ;;  %v479_v3 = vld [vmem:[%s2433_s2 + $0x18] sm:$0xff] (!%p472_p5)  ;;  %v480_v4 = vld [vmem:[%s2433_s2 + $0x20] sm:$0xff] (!%p472_p5) }
  0x32   : > { %s1571_s27 = sshll.u32 %s449_s22, 3  ;;  %s1667_s15 = sshll.u32 %s2061_s19, 5  ;;  %485 = vst.msk [vmem:[#allocation2 + $0x10] sm:$0xff] (!%p472_p5), %vm482_vm0, %v478_v2  ;;  %v481_v5 = vld [vmem:[%s2433_s2 + $0x28] sm:$0xff] (!%p472_p5)  ;;  %486 = vst.msk [vmem:[#allocation2 + $0x18] sm:$0xff] (!%p472_p5), %vm482_vm0, %v479_v3 }
  0x33   : > { %s2054_s29 = scalar_lea.vmem %s2452_s0, %s1567_s26  ;;  %s2068_s26 = scalar_lea.vmem %s2435_s4, %s1666_s21  ;;  %487 = vst.msk [vmem:[#allocation2 + $0x20] sm:$0xff] (!%p472_p5), %vm482_vm0, %v480_v4  ;;  %488 = vst.msk [vmem:[#allocation2 + $0x28] sm:$0xff] (!%p472_p5), %vm482_vm0, %v481_v5 }
  0x34   : > { %s2077_s16 = scalar_lea.vmem %s2434_s3, %s1571_s27  ;;  %s2083_s24 = scalar_lea.vmem %s2437_s6, %s1667_s15 }
  0x35   : > { %s468_s21 = scalar_lea.vmem %s2438_s7, %s2061_s19  ;;  %475 = sbr.rel (%p472_p5) target bundleno = 60 (0x3c), region = 64 }
  0x3c PF: > { %p1576_p8 = scmp.ne.s32.totalorder %s1913_s30, 0 }
  0x3d   : > { %vm492_vm1 = vcmask (!%p1576_p8), 261120   ;;  %v1932_v6 = vmov (!%p1576_p8), 0.0  }
  0x3e   : > { %491 = sbr.rel (%p1576_p8) target bundleno = 69 (0x45), region = 68  ;;  %493 = vst.msk [vmem:[#allocation3] sm:$0xff] (!%p1576_p8), %vm492_vm1, %v1932_v6  ;;  %494 = vst.msk [vmem:[#allocation3 + $0x8] sm:$0xff] (!%p1576_p8), %vm492_vm1, %v1932_v6 }
  0x3f   : > { %495 = vst.msk [vmem:[#allocation3 + $0x10] sm:$0xff] (!%p1576_p8), %vm492_vm1, %v1932_v6  ;;  %496 = vst.msk [vmem:[#allocation3 + $0x18] sm:$0xff] (!%p1576_p8), %vm492_vm1, %v1932_v6 }
  0x40   : > { %497 = vst.msk [vmem:[#allocation3 + $0x20] sm:$0xff] (!%p1576_p8), %vm492_vm1, %v1932_v6  ;;  %498 = vst.msk [vmem:[#allocation3 + $0x28] sm:$0xff] (!%p1576_p8), %vm492_vm1, %v1932_v6 }
  0x45 PF: > { %v501_v7 = vld [vmem:[%s2054_s29 + $0x10] sm:$0xff]  ;;  %v499_v8 = vld [vmem:[%s2054_s29] sm:$0xff]  ;;  %v1933_v9 = vmov 0   ;;  %v502_v10 = vld [vmem:[%s2054_s29 + $0x18] sm:$0xff]  ;;  %v532_v49 = vlaneseq  ;;  %vm840_vm6 = vcmask 392192   ;;  %v1934_v55 = vmov 0.0   ;;  %s2453_s23 = scalar_lea.vmem %s2432_s1, %s2479_s25 }
  0x46   : > { %1865 = vset.pattern.permute.xlu1 %v1933_v9  ;;  %1864 = vset.pattern.permute.xlu0 %v1933_v9  ;;  %v500_v11 = vld [vmem:[%s2054_s29 + $0x8] sm:$0xff]  ;;  %v503_v13 = vld [vmem:[%s2054_s29 + $0x20] sm:$0xff]  ;;  %v506_v14 = vld [vmem:[%s2054_s29 + $0x38] sm:$0xff]  ;;  %p1649_p9 = scmp.ne.s32.totalorder %s1913_s30, 1 }
  0x47   : > { %548 = vperm.xlu1 %1865, %v501_v7   ;;  %542 = vperm.xlu0 %1864, %v499_v8   ;;  %v504_v12 = vld [vmem:[%s2054_s29 + $0x28] sm:$0xff]  ;;  %v505_v15 = vld [vmem:[%s2054_s29 + $0x30] sm:$0xff]  ;;  %v799_v16 = vld [vmem:[#allocation2] sm:$0xff]  ;;  %v2141_v50 = vand.u32 127, %v532_v49  ;;  %p1411_p10 = scmp.eq.s32.totalorder (!%p1649_p9), %s1917_s10, 1 }
  0x48   : > { %v800_v17 = vld [vmem:[#allocation2 + $0x8] sm:$0xff]  ;;  %v801_v18 = vld [vmem:[#allocation2 + $0x10] sm:$0xff]  ;;  %v802_v19 = vld [vmem:[#allocation2 + $0x18] sm:$0xff] }
  0x49   : > { %v805_v20 = vpack.c.bf16 %v800_v17, %v799_v16  ;;  %v806_v21 = vpack.c.bf16 %v802_v19, %v801_v18  ;;  %v803_v22 = vld [vmem:[#allocation2 + $0x20] sm:$0xff]  ;;  %v804_v23 = vld [vmem:[#allocation2 + $0x28] sm:$0xff]  ;;  %v510_v27 = vld [vmem:[%s2054_s29 + $0x58] sm:$0xff] }
  0x4a   : > { %v508_v24 = vld [vmem:[%s2054_s29 + $0x48] sm:$0xff]  ;;  %v507_v25 = vld [vmem:[%s2054_s29 + $0x40] sm:$0xff]  ;;  %v807_v26 = vpack.c.bf16 %v804_v23, %v803_v22  ;;  %v509_v28 = vld [vmem:[%s2054_s29 + $0x50] sm:$0xff] }
  0x4b   : > { %551 = vperm.xlu1 %1865, %v502_v10   ;;  %545 = vperm.xlu0 %1864, %v500_v11   ;;  %v512_v29 = vld [vmem:[%s2054_s29 + $0x68] sm:$0xff]  ;;  %v511_v30 = vld [vmem:[%s2054_s29 + $0x60] sm:$0xff]  ;;  %v514_v31 = vld [vmem:[%s2054_s29 + $0x78] sm:$0xff] }
  0x4c   : > { %1733 = vmatprep.subr.bf16.mxu0 %v805_v20  ;;  %v513_v32 = vld [vmem:[%s2054_s29 + $0x70] sm:$0xff]  ;;  %v516_v33 = vld [vmem:[%s2054_s29 + $0x88] sm:$0xff]  ;;  %v515_v34 = vld [vmem:[%s2054_s29 + $0x80] sm:$0xff] }
  0x4d   : > { %1734 = vmatpush3.bf16.msra.mxu0 %v805_v20  ;;  %v518_v35 = vld [vmem:[%s2054_s29 + $0x98] sm:$0xff]  ;;  %v517_v36 = vld [vmem:[%s2054_s29 + $0x90] sm:$0xff]  ;;  %v520_v37 = vld [vmem:[%s2054_s29 + $0xa8] sm:$0xff] }
  0x4e   : > { %1735 = vmatprep.subr.bf16.mxu0 %v806_v21  ;;  %v519_v38 = vld [vmem:[%s2054_s29 + $0xa0] sm:$0xff]  ;;  %v522_v39 = vld [vmem:[%s2054_s29 + $0xb8] sm:$0xff]  ;;  %v521_v40 = vld [vmem:[%s2054_s29 + $0xb0] sm:$0xff] }
  0x4f   : > { %557 = vperm.xlu1 %1865, %v504_v12   ;;  %554 = vperm.xlu0 %1864, %v503_v13   ;;  %v524_v41 = vld [vmem:[%s2054_s29 + $0xc8] sm:$0xff]  ;;  %v523_v42 = vld [vmem:[%s2054_s29 + $0xc0] sm:$0xff]  ;;  %v526_v43 = vld [vmem:[%s2054_s29 + $0xd8] sm:$0xff] }
  0x50   : > { %v525_v44 = vld [vmem:[%s2054_s29 + $0xd0] sm:$0xff]  ;;  %v528_v45 = vld [vmem:[%s2054_s29 + $0xe8] sm:$0xff]  ;;  %v527_v46 = vld [vmem:[%s2054_s29 + $0xe0] sm:$0xff] }
  0x51   : > { %1736 = vmatpush3.bf16.msra.mxu0 %v806_v21  ;;  %v530_v47 = vld [vmem:[%s2054_s29 + $0xf8] sm:$0xff]  ;;  %v529_v48 = vld [vmem:[%s2054_s29 + $0xf0] sm:$0xff] }
  0x52   : > { %1737 = vmatprep.subr.bf16.mxu0 %v807_v26 }
  0x53   : > { %563 = vperm.xlu1 %1865, %v506_v14   ;;  %560 = vperm.xlu0 %1864, %v505_v15  }
  0x55   : > { %1738 = vmatpush3.bf16.msra.mxu0 %v807_v26 }
  0x57   : > { %569 = vperm.xlu1 %1865, %v508_v24   ;;  %566 = vperm.xlu0 %1864, %v507_v25  }
  0x5b   : > { %575 = vperm.xlu1 %1865, %v510_v27   ;;  %572 = vperm.xlu0 %1864, %v509_v28  }
  0x5f   : > { %581 = vperm.xlu1 %1865, %v512_v29   ;;  %578 = vperm.xlu0 %1864, %v511_v30  }
  0x63   : > { %587 = vperm.xlu1 %1865, %v514_v31   ;;  %584 = vperm.xlu0 %1864, %v513_v32  }
  0x67   : > { %593 = vperm.xlu1 %1865, %v516_v33   ;;  %590 = vperm.xlu0 %1864, %v515_v34  }
  0x6b   : > { %599 = vperm.xlu1 %1865, %v518_v35   ;;  %596 = vperm.xlu0 %1864, %v517_v36  }
  0x6f   : > { %605 = vperm.xlu1 %1865, %v520_v37   ;;  %602 = vperm.xlu0 %1864, %v519_v38  }
  0x73   : > { %611 = vperm.xlu1 %1865, %v522_v39   ;;  %608 = vperm.xlu0 %1864, %v521_v40  }
  0x77   : > { %617 = vperm.xlu1 %1865, %v524_v41   ;;  %614 = vperm.xlu0 %1864, %v523_v42  }
  0x7b   : > { %623 = vperm.xlu1 %1865, %v526_v43   ;;  %620 = vperm.xlu0 %1864, %v525_v44  }
  0x7f   : > { %629 = vperm.xlu1 %1865, %v528_v45   ;;  %626 = vperm.xlu0 %1864, %v527_v46  }
  0x83   : > { %635 = vperm.xlu1 %1865, %v530_v47   ;;  %632 = vperm.xlu0 %1864, %v529_v48  }
  0xc6   : > { %v549_v51 = vpop.permute.xlu1 %548  ;;  %v543_v52 = vpop.permute.xlu0 %542 }
  0xc7   : > { %vm639_vm2 = vcmp.eq.s32.totalorder %v549_v51, %v2141_v50  ;;  %vm637_vm3 = vcmp.eq.s32.totalorder %v543_v52, %v2141_v50 }
  0xc8   : > { %v1579_v56 = vsel %vm639_vm2, 1.0, %v1934_v55  ;;  %v1577_v57 = vsel %vm637_vm3, 1.0, %v1934_v55 }
  0xca   : > { %v552_v53 = vpop.permute.xlu1 %551  ;;  %v546_v54 = vpop.permute.xlu0 %545 }
  0xcb   : > { %vm640_vm4 = vcmp.eq.s32.totalorder %v552_v53, %v2141_v50  ;;  %vm638_vm5 = vcmp.eq.s32.totalorder %v546_v54, %v2141_v50 }
  0xcc   : > { %v1580_v58 = vsel %vm640_vm4, 1.0, %v1934_v55  ;;  %v1578_v59 = vsel %vm638_vm5, 1.0, %v1934_v55 }
  0xcd   : > { %v734_v60 = vpack.c.bf16 %v1580_v58, %v1579_v56  ;;  %v733_v61 = vpack.c.bf16 %v1578_v59, %v1577_v57 }
  0xce   : > { %v558_v62 = vpop.permute.xlu1 %557  ;;  %v555_v63 = vpop.permute.xlu0 %554 }
  0xcf   : > { %vm642_vm7 = vcmp.eq.s32.totalorder %v558_v62, %v2141_v50  ;;  %vm641_vm8 = vcmp.eq.s32.totalorder %v555_v63, %v2141_v50  ;;  %1739 = vmatprep.mubr.msk.bf16.mxu0 %vm840_vm6, %v733_v61 }
  0xd0   : > { %v1582_v0 = vsel %vm642_vm7, 1.0, %v1934_v55  ;;  %v1581_v1 = vsel %vm641_vm8, 1.0, %v1934_v55  ;;  %1740 = vmatmul.mubr.msk.bf16.vlgmr.msra.gmra.mrb[0].mxu0 %vm840_vm6, %v734_v60 }
  0xd1   : > { %v735_v2 = vpack.c.bf16 %v1582_v0, %v1581_v1 }
  0xd2   : > { %v564_v3 = vpop.permute.xlu1 %563  ;;  %v561_v4 = vpop.permute.xlu0 %560 }
  0xd3   : > { %vm644_vm9 = vcmp.eq.s32.totalorder %v564_v3, %v2141_v50  ;;  %vm643_vm10 = vcmp.eq.s32.totalorder %v561_v4, %v2141_v50  ;;  %1743 = vmatprep.mubr.msk.bf16.mxu0 %vm840_vm6, %v735_v2 }
  0xd4   : > { %v1584_v5 = vsel %vm644_vm9, 1.0, %v1934_v55  ;;  %v1583_v6 = vsel %vm643_vm10, 1.0, %v1934_v55 }
  0xd5   : > { %v736_v7 = vpack.c.bf16 %v1584_v5, %v1583_v6 }
  0xd6   : > { %v570_v8 = vpop.permute.xlu1 %569  ;;  %v567_v9 = vpop.permute.xlu0 %566 }
  0xd7   : > { %vm646_vm11 = vcmp.eq.s32.totalorder %v570_v8, %v2141_v50  ;;  %vm645_vm12 = vcmp.eq.s32.totalorder %v567_v9, %v2141_v50  ;;  %v531_v9 = vld [vmem:[%s2453_s23] sm:$0x3] }
  0xd8   : > { %v1586_v10 = vsel %vm646_vm11, 1.0, %v1934_v55  ;;  %v1585_v11 = vsel %vm645_vm12, 1.0, %v1934_v55  ;;  %1744 = vmatmul.mubr.msk.bf16.gmra.mrb[4].mxu0 %vm840_vm6, %v736_v7  ;;  %v535_v7 = vshrl.u32 %v532_v49, 7 }
  0xd9   : > { %v737_v12 = vpack.c.bf16 %v1586_v10, %v1585_v11 }
  0xda   : > { %v576_v13 = vpop.permute.xlu1 %575  ;;  %v573_v14 = vpop.permute.xlu0 %572  ;;  %v755_v8 = vsub.s32 1, %v535_v7  ;;  %v751_v10 = vsub.s32 0, %v535_v7  ;;  %v536_v11 = vadd.s32 8, %v535_v7 }
  0xdb   : > { %vm648_vm13 = vcmp.eq.s32.totalorder %v576_v13, %v2141_v50  ;;  %vm647_vm14 = vcmp.eq.s32.totalorder %v573_v14, %v2141_v50  ;;  %1747 = vmatprep.mubr.msk.bf16.mxu0 %vm840_vm6, %v737_v12  ;;  %v537_v13 = vadd.s32 16, %v535_v7  ;;  %v538_v14 = vadd.s32 24, %v535_v7 }
  0xdc   : > { %v1588_v15 = vsel %vm648_vm13, 1.0, %v1934_v55  ;;  %v1587_v16 = vsel %vm647_vm14, 1.0, %v1934_v55  ;;  %v752_v12 = vrot.slane %v531_v9, %v751_v10 }
  0xdd   : > { %v738_v17 = vpack.c.bf16 %v1588_v15, %v1587_v16  ;;  %v1083_v15 = vld [vmem:[#allocation3 + $0x8] sm:$0xff] }
  0xde   : > { %v582_v18 = vpop.permute.xlu1 %581  ;;  %v579_v19 = vpop.permute.xlu0 %578 }
  0xdf   : > { %vm650_vm15 = vcmp.eq.s32.totalorder %v582_v18, %v2141_v50  ;;  %vm649_vm0 = vcmp.eq.s32.totalorder %v579_v19, %v2141_v50  ;;  %v540_v18 = vadd.s32 40, %v535_v7 }
  0xe0   : > { %v1590_v20 = vsel %vm650_vm15, 1.0, %v1934_v55  ;;  %v1589_v21 = vsel %vm649_vm0, 1.0, %v1934_v55  ;;  %1748 = vmatmul.mubr.msk.bf16.gmra.mrb[8].mxu0 %vm840_vm6, %v738_v17  ;;  %v539_v17 = vadd.s32 32, %v535_v7 }
  0xe1   : > { %v739_v22 = vpack.c.bf16 %v1590_v20, %v1589_v21  ;;  %v810_v21 = vld [vmem:[%s2077_s16 + $0x10] sm:$0xff] }
  0xe2   : > { %v588_v23 = vpop.permute.xlu1 %587  ;;  %v585_v24 = vpop.permute.xlu0 %584 }
  0xe3   : > { %vm652_vm1 = vcmp.eq.s32.totalorder %v588_v23, %v2141_v50  ;;  %vm651_vm2 = vcmp.eq.s32.totalorder %v585_v24, %v2141_v50  ;;  %1751 = vmatprep.mubr.msk.bf16.mxu0 %vm840_vm6, %v739_v22  ;;  %v808_v22 = vld [vmem:[%s2077_s16] sm:$0xff]  ;;  %v811_v24 = vld [vmem:[%s2077_s16 + $0x18] sm:$0xff] }
  0xe4   : > { %v1592_v25 = vsel %vm652_vm1, 1.0, %v1934_v55  ;;  %v1591_v26 = vsel %vm651_vm2, 1.0, %v1934_v55 }
  0xe5   : > { %v740_v27 = vpack.c.bf16 %v1592_v25, %v1591_v26 }
  0xe6   : > { %v594_v28 = vpop.permute.xlu1 %593  ;;  %v591_v29 = vpop.permute.xlu0 %590 }
  0xe7   : > { %vm654_vm3 = vcmp.eq.s32.totalorder %v594_v28, %v2141_v50  ;;  %vm653_vm4 = vcmp.eq.s32.totalorder %v591_v29, %v2141_v50 }
  0xe8   : > { %v1594_v30 = vsel %vm654_vm3, 1.0, %v1934_v55  ;;  %v1593_v31 = vsel %vm653_vm4, 1.0, %v1934_v55  ;;  %1752 = vmatmul.mubr.msk.bf16.gmra.mrb[12].mxu0 %vm840_vm6, %v740_v27  ;;  %v809_v27 = vld [vmem:[%s2077_s16 + $0x8] sm:$0xff] }
  0xe9   : > { %v741_v32 = vpack.c.bf16 %v1594_v30, %v1593_v31 }
  0xea   : > { %v600_v33 = vpop.permute.xlu1 %599  ;;  %v597_v34 = vpop.permute.xlu0 %596 }
  0xeb   : > { %vm656_vm5 = vcmp.eq.s32.totalorder %v600_v33, %v2141_v50  ;;  %vm655_vm7 = vcmp.eq.s32.totalorder %v597_v34, %v2141_v50  ;;  %1755 = vmatprep.mubr.msk.bf16.mxu0 %vm840_vm6, %v741_v32 }
  0xec   : > { %v1596_v35 = vsel %vm656_vm5, 1.0, %v1934_v55  ;;  %v1595_v36 = vsel %vm655_vm7, 1.0, %v1934_v55 }
  0xed   : > { %v742_v37 = vpack.c.bf16 %v1596_v35, %v1595_v36 }
  0xee   : > { %v606_v38 = vpop.permute.xlu1 %605  ;;  %v603_v39 = vpop.permute.xlu0 %602 }
  0xef   : > { %vm658_vm8 = vcmp.eq.s32.totalorder %v606_v38, %v2141_v50  ;;  %vm657_vm9 = vcmp.eq.s32.totalorder %v603_v39, %v2141_v50  ;;  %v812_v39 = vld [vmem:[%s2077_s16 + $0x20] sm:$0xff] }
  0xf0   : > { %v1598_v40 = vsel %vm658_vm8, 1.0, %v1934_v55  ;;  %v1597_v41 = vsel %vm657_vm9, 1.0, %v1934_v55  ;;  %1756 = vmatmul.mubr.msk.bf16.gmra.mrb[16].mxu0 %vm840_vm6, %v742_v37  ;;  %vm757_vm8 = vcmp.eq.s32.totalorder %v752_v12, %v535_v7  ;;  %vm759_vm9 = vcmp.eq.s32.totalorder %v752_v12, %v536_v11  ;;  %v814_v37 = vld [vmem:[%s2077_s16 + $0x30] sm:$0xff] }
  0xf1   : > { %v743_v42 = vpack.c.bf16 %v1598_v40, %v1597_v41  ;;  %v815_v41 = vld [vmem:[%s2077_s16 + $0x38] sm:$0xff] }
  0xf2   : > { %v612_v43 = vpop.permute.xlu1 %611  ;;  %v609_v44 = vpop.permute.xlu0 %608 }
  0xf3   : > { %vm660_vm10 = vcmp.eq.s32.totalorder %v612_v43, %v2141_v50  ;;  %vm659_vm11 = vcmp.eq.s32.totalorder %v609_v44, %v2141_v50  ;;  %1759 = vmatprep.mubr.msk.bf16.mxu0 %vm840_vm6, %v743_v42 }
  0xf4   : > { %v1600_v45 = vsel %vm660_vm10, 1.0, %v1934_v55  ;;  %v1599_v46 = vsel %vm659_vm11, 1.0, %v1934_v55 }
  0xf5   : > { %v744_v47 = vpack.c.bf16 %v1600_v45, %v1599_v46  ;;  %v813_v45 = vld [vmem:[%s2077_s16 + $0x28] sm:$0xff] }
  0xf6   : > { %v618_v48 = vpop.permute.xlu1 %617  ;;  %v615_v51 = vpop.permute.xlu0 %614 }
  0xf7   : > { %vm662_vm12 = vcmp.eq.s32.totalorder %v618_v48, %v2141_v50  ;;  %vm661_vm13 = vcmp.eq.s32.totalorder %v615_v51, %v2141_v50 }
  0xf8   : > { %v1602_v52 = vsel %vm662_vm12, 1.0, %v1934_v55  ;;  %v1601_v53 = vsel %vm661_vm13, 1.0, %v1934_v55  ;;  %1760 = vmatmul.mubr.msk.bf16.gmra.mrb[20].mxu0 %vm840_vm6, %v744_v47  ;;  %vm761_vm12 = vcmp.eq.s32.totalorder %v752_v12, %v537_v13  ;;  %vm763_vm13 = vcmp.eq.s32.totalorder %v752_v12, %v538_v14 }
  0xf9   : > { %v745_v54 = vpack.c.bf16 %v1602_v52, %v1601_v53 }
  0xfa   : > { %v624_v56 = vpop.permute.xlu1 %623  ;;  %v621_v57 = vpop.permute.xlu0 %620 }
  0xfb   : > { %vm664_vm14 = vcmp.eq.s32.totalorder %v624_v56, %v2141_v50  ;;  %vm663_vm15 = vcmp.eq.s32.totalorder %v621_v57, %v2141_v50  ;;  %1763 = vmatprep.mubr.msk.bf16.mxu0 %vm840_vm6, %v745_v54 }
  0xfc   : > { %v1604_v58 = vsel %vm664_vm14, 1.0, %v1934_v55  ;;  %v1603_v59 = vsel %vm663_vm15, 1.0, %v1934_v55  ;;  %vm2238_vm15 = vmpackc.low %vm763_vm13, %vm761_vm12 }
  0xfd   : > { %v746_v60 = vpack.c.bf16 %v1604_v58, %v1603_v59  ;;  %v818_v58 = vld [vmem:[%s2077_s16 + $0x50] sm:$0xff] }
  0xfe   : > { %v630_v61 = vpop.permute.xlu1 %629  ;;  %v627_v62 = vpop.permute.xlu0 %626 }
  0xff   : > { %vm666_vm0 = vcmp.eq.s32.totalorder %v630_v61, %v2141_v50  ;;  %vm665_vm1 = vcmp.eq.s32.totalorder %v627_v62, %v2141_v50 }
 0x100   : > { %v1606_v63 = vsel %vm666_vm0, 1.0, %v1934_v55  ;;  %v1605_v0 = vsel %vm665_vm1, 1.0, %v1934_v55  ;;  %1764 = vmatmul.mubr.msk.bf16.gmra.mrb[24].mxu0 %vm840_vm6, %v746_v60  ;;  %v816_v60 = vld [vmem:[%s2077_s16 + $0x40] sm:$0xff] }
 0x101   : > { %v747_v1 = vpack.c.bf16 %v1606_v63, %v1605_v0  ;;  %v819_v63 = vld [vmem:[%s2077_s16 + $0x58] sm:$0xff] }
 0x102   : > { %v636_v2 = vpop.permute.xlu1 %635  ;;  %v633_v3 = vpop.permute.xlu0 %632 }
 0x103   : > { %vm668_vm2 = vcmp.eq.s32.totalorder %v636_v2, %v2141_v50  ;;  %vm667_vm3 = vcmp.eq.s32.totalorder %v633_v3, %v2141_v50  ;;  %1767 = vmatprep.mubr.msk.bf16.mxu0 %vm840_vm6, %v747_v1  ;;  %v756_v50 = vrot.slane %v531_v9, %v755_v8  ;;  %v817_v2 = vld [vmem:[%s2077_s16 + $0x48] sm:$0xff] }
 0x104   : > { %v1608_v4 = vsel %vm668_vm2, 1.0, %v1934_v55  ;;  %v1607_v5 = vsel %vm667_vm3, 1.0, %v1934_v55  ;;  %v1935_v55 = vmov 1.0|1.0   ;;  %vm765_vm2 = vcmp.eq.s32.totalorder %v752_v12, %v539_v17 }
 0x105   : > { %v748_v6 = vpack.c.bf16 %v1608_v4, %v1607_v5  ;;  %vm758_vm4 = vcmp.eq.s32.totalorder %v756_v50, %v535_v7  ;;  %vm760_vm5 = vcmp.eq.s32.totalorder %v756_v50, %v536_v11  ;;  %vm762_vm10 = vcmp.eq.s32.totalorder %v756_v50, %v537_v13  ;;  %v820_v13 = vld [vmem:[%s2077_s16 + $0x60] sm:$0xff] }
 0x106   : > { %vm1637_vm7 = vmpackc.low %vm760_vm5, %vm758_vm4  ;;  %vm764_vm11 = vcmp.eq.s32.totalorder %v756_v50, %v538_v14  ;;  %vm766_vm0 = vcmp.eq.s32.totalorder %v756_v50, %v539_v17  ;;  %vm768_vm1 = vcmp.eq.s32.totalorder %v756_v50, %v540_v18  ;;  %vm767_vm3 = vcmp.eq.s32.totalorder %v752_v12, %v540_v18  ;;  %v822_v50 = vld [vmem:[%s2077_s16 + $0x70] sm:$0xff]  ;;  %v823_v18 = vld [vmem:[%s2077_s16 + $0x78] sm:$0xff] }
 0x107   : > { %1638 = vmatprep.mubr.msk.bf16.mxu1 %vm1637_vm7, %v1935_v55  ;;  %vm2234_vm14 = vmpackc.low %vm764_vm11, %vm762_vm10  ;;  %vm1167_vm7 = vcmask 261120  }
 0x108   : > { %1768 = vmatmul.mubr.msk.bf16.gmra.mrb[28].mxu0 %vm840_vm6, %v748_v6  ;;  %vm2230_vm6 = vmpackc.low %vm759_vm9, %vm757_vm8  ;;  %vm1937_vm8 = vmmov (!%p1649_p9), 0   ;;  %vm1344_vm9 = vcmask (!%p1649_p9), 523264  }
 0x109   : > { %vm2242_vm4 = vmpackc.low %vm768_vm1, %vm766_vm0 }
 0x10a   : > { %vm2246_vm5 = vmpackc.low %vm767_vm3, %vm765_vm2 }
 0x1a3   : > { %v1741_v23 = vpop.f32.mrb[0].mxu0 }
 0x1a4   : > { %v932_v25 = vadd.f32 %v1741_v23, %v810_v21  ;;  %v923_v26 = vpop.f32.mrb[1].mxu0  ;;  %v821_v23 = vld [vmem:[%s2077_s16 + $0x68] sm:$0xff] }
 0x1a5   : > { %v924_v28 = vadd.f32 %v923_v26, %v808_v22  ;;  %v1742_v29 = vpop.f32.mrb[2].mxu0 }
 0x1a6   : > { %v935_v30 = vadd.f32 %v1742_v29, %v811_v24  ;;  %v926_v31 = vpop.f32.mrb[3].mxu0  ;;  %v1052_v33 = vmax.f32 %v932_v25, 0.0 }
 0x1a7   : > { %v927_v32 = vadd.f32 %v926_v31, %v809_v27  ;;  %v1050_v35 = vmax.f32 %v924_v28, 0.0 }
 0x1a8   : > { %v1053_v34 = vmax.f32 %v935_v30, 0.0 }
 0x1a9   : > { %v1051_v36 = vmax.f32 %v927_v32, 0.0 }
 0x1aa   : > { %v2255_v38 = vpack.c.bf16 %v1053_v34, %v1052_v33  ;;  %v826_v33 = vld [vmem:[%s2077_s16 + $0x90] sm:$0xff] }
 0x1ab   : > { %v1745_v40 = vpop.f32.mrb[4].mxu0  ;;  %v2259_v42 = vpack.c.bf16 %v1051_v36, %v1050_v35  ;;  %v824_v35 = vld [vmem:[%s2077_s16 + $0x80] sm:$0xff] }
 0x1ac   : > { %v948_v43 = vadd.f32 %v1745_v40, %v814_v37  ;;  %v939_v44 = vpop.f32.mrb[5].mxu0 }
 0x1ad   : > { %v940_v46 = vadd.f32 %v939_v44, %v812_v39  ;;  %v1746_v47 = vpop.f32.mrb[6].mxu0  ;;  %v827_v39 = vld [vmem:[%s2077_s16 + $0x98] sm:$0xff] }
 0x1ae   : > { %v951_v48 = vadd.f32 %v1746_v47, %v815_v41  ;;  %v942_v51 = vpop.f32.mrb[7].mxu0  ;;  %v1056_v53 = vmax.f32 %v948_v43, 0.0  ;;  %v825_v43 = vld [vmem:[%s2077_s16 + $0x88] sm:$0xff] }
 0x1af   : > { %v943_v52 = vadd.f32 %v942_v51, %v813_v45  ;;  %v1054_v56 = vmax.f32 %v940_v46, 0.0 }
 0x1b0   : > { %v1057_v54 = vmax.f32 %v951_v48, 0.0 }
 0x1b1   : > { %v1055_v57 = vmax.f32 %v943_v52, 0.0 }
 0x1b2   : > { %v2263_v59 = vpack.c.bf16 %v1057_v54, %v1056_v53 }
 0x1b3   : > { %v2266_v61 = vpack.c.bf16 %v1055_v57, %v1054_v56  ;;  %v1749_v62 = vpop.f32.mrb[8].mxu0  ;;  %v830_v56 = vld [vmem:[%s2077_s16 + $0xb0] sm:$0xff] }
 0x1b4   : > { %v964_v0 = vadd.f32 %v1749_v62, %v818_v58  ;;  %v955_v1 = vpop.f32.mrb[9].mxu0  ;;  %v828_v58 = vld [vmem:[%s2077_s16 + $0xa0] sm:$0xff]  ;;  %v831_v62 = vld [vmem:[%s2077_s16 + $0xb8] sm:$0xff] }
 0x1b5   : > { %v956_v3 = vadd.f32 %v955_v1, %v816_v60  ;;  %v1750_v4 = vpop.f32.mrb[10].mxu0 }
 0x1b6   : > { %v967_v5 = vadd.f32 %v1750_v4, %v819_v63  ;;  %v958_v6 = vpop.f32.mrb[11].mxu0  ;;  %v1060_v8 = vmax.f32 %v964_v0, 0.0 }
 0x1b7   : > { %v959_v7 = vadd.f32 %v958_v6, %v817_v2  ;;  %v1058_v10 = vmax.f32 %v956_v3, 0.0  ;;  %v829_v2 = vld [vmem:[%s2077_s16 + $0xa8] sm:$0xff] }
 0x1b8   : > { %v1061_v9 = vmax.f32 %v967_v5, 0.0 }
 0x1b9   : > { %v1059_v11 = vmax.f32 %v959_v7, 0.0 }
 0x1ba   : > { %v2271_v12 = vpack.c.bf16 %v1061_v9, %v1060_v8 }
 0x1bb   : > { %v2274_v14 = vpack.c.bf16 %v1059_v11, %v1058_v10  ;;  %v1753_v17 = vpop.f32.mrb[12].mxu0 }
 0x1bc   : > { %v980_v21 = vadd.f32 %v1753_v17, %v822_v50  ;;  %v971_v22 = vpop.f32.mrb[13].mxu0  ;;  %v834_v50 = vld [vmem:[%s2077_s16 + $0xd0] sm:$0xff]  ;;  %v832_v17 = vld [vmem:[%s2077_s16 + $0xc0] sm:$0xff] }
 0x1bd   : > { %v972_v24 = vadd.f32 %v971_v22, %v820_v13  ;;  %v1754_v25 = vpop.f32.mrb[14].mxu0  ;;  %v835_v22 = vld [vmem:[%s2077_s16 + $0xd8] sm:$0xff] }
 0x1be   : > { %v983_v26 = vadd.f32 %v1754_v25, %v823_v18  ;;  %v974_v27 = vpop.f32.mrb[15].mxu0  ;;  %v1064_v29 = vmax.f32 %v980_v21, 0.0  ;;  %v833_v25 = vld [vmem:[%s2077_s16 + $0xc8] sm:$0xff] }
 0x1bf   : > { %v975_v28 = vadd.f32 %v974_v27, %v821_v23  ;;  %v1062_v31 = vmax.f32 %v972_v24, 0.0 }
 0x1c0   : > { %v1065_v30 = vmax.f32 %v983_v26, 0.0 }
 0x1c1   : > { %v1063_v32 = vmax.f32 %v975_v28, 0.0 }
 0x1c2   : > { %v2279_v34 = vpack.c.bf16 %v1065_v30, %v1064_v29 }
 0x1c3   : > { %v2282_v36 = vpack.c.bf16 %v1063_v32, %v1062_v31  ;;  %v1757_v37 = vpop.f32.mrb[16].mxu0 }
 0x1c4   : > { %v996_v40 = vadd.f32 %v1757_v37, %v826_v33  ;;  %v987_v41 = vpop.f32.mrb[17].mxu0  ;;  %v838_v33 = vld [vmem:[%s2077_s16 + $0xf0] sm:$0xff]  ;;  %v836_v37 = vld [vmem:[%s2077_s16 + $0xe0] sm:$0xff] }
 0x1c5   : > { %v988_v44 = vadd.f32 %v987_v41, %v824_v35  ;;  %v1758_v45 = vpop.f32.mrb[18].mxu0  ;;  %v839_v41 = vld [vmem:[%s2077_s16 + $0xf8] sm:$0xff] }
 0x1c6   : > { %v999_v46 = vadd.f32 %v1758_v45, %v827_v39  ;;  %v990_v47 = vpop.f32.mrb[19].mxu0  ;;  %v1068_v51 = vmax.f32 %v996_v40, 0.0  ;;  %v837_v45 = vld [vmem:[%s2077_s16 + $0xe8] sm:$0xff]  ;;  %s1178_s16 = sld [smem:[#allocation4 + %s1917_s10]] (!%p1649_p9) }
 0x1c7   : > { %v991_v48 = vadd.f32 %v990_v47, %v825_v43  ;;  %v1066_v53 = vmax.f32 %v988_v44, 0.0 }
 0x1c8   : > { %v1069_v52 = vmax.f32 %v999_v46, 0.0 }
 0x1c9   : > { %v1067_v54 = vmax.f32 %v991_v48, 0.0 }
 0x1ca   : > { %v1097_v57 = vpack.c.bf16 %v1069_v52, %v1068_v51 }
 0x1cb   : > { %v1761_v60 = vpop.f32.mrb[20].mxu0  ;;  %v1096_v63 = vpack.c.bf16 %v1067_v54, %v1066_v53 }
 0x1cc   : > { %v1012_v0 = vadd.f32 %v1761_v60, %v830_v56  ;;  %v1003_v1 = vpop.f32.mrb[21].mxu0 }
 0x1cd   : > { %v1004_v3 = vadd.f32 %v1003_v1, %v828_v58  ;;  %v1762_v4 = vpop.f32.mrb[22].mxu0  ;;  %1687 = vmatprep.subr.bf16.mxu1 %v1096_v63  ;;  %v1084_v63 = vld [vmem:[#allocation3 + $0x10] sm:$0xff]  ;;  %v1085_v1 = vld [vmem:[#allocation3 + $0x18] sm:$0xff] }
 0x1ce   : > { %v1015_v5 = vadd.f32 %v1762_v4, %v831_v62  ;;  %v1006_v6 = vpop.f32.mrb[23].mxu0  ;;  %1688 = vmatpush3.bf16.msra.mxu1 %v2259_v42  ;;  %v1072_v8 = vmax.f32 %v1012_v0, 0.0 }
 0x1cf   : > { %v1007_v7 = vadd.f32 %v1006_v6, %v829_v2  ;;  %1689 = vmatprep.subr.bf16.mxu1 %v1097_v57  ;;  %v1070_v10 = vmax.f32 %v1004_v3, 0.0 }
 0x1d0   : > { %v1073_v9 = vmax.f32 %v1015_v5, 0.0 }
 0x1d1   : > { %v1071_v11 = vmax.f32 %v1007_v7, 0.0  ;;  %v1086_v7 = vld [vmem:[#allocation3 + $0x20] sm:$0xff] }
 0x1d2   : > { %v1099_v13 = vpack.c.bf16 %v1073_v9, %v1072_v8  ;;  %1690 = vmatpush3.bf16.msra.mxu1 %v2255_v38 }
 0x1d3   : > { %v1098_v18 = vpack.c.bf16 %v1071_v11, %v1070_v10  ;;  %v1765_v21 = vpop.f32.mrb[24].mxu0  ;;  %v1087_v11 = vld [vmem:[#allocation3 + $0x28] sm:$0xff] }
 0x1d4   : > { %v1028_v23 = vadd.f32 %v1765_v21, %v834_v50  ;;  %v1019_v24 = vpop.f32.mrb[25].mxu0  ;;  %v1866_v21 = vld [vmem:[%s2068_s26] sm:$0xff] (!%p1649_p9)  }
 0x1d5   : > { %v1020_v42 = vadd.f32 %v1019_v24, %v832_v17  ;;  %v1766_v26 = vpop.f32.mrb[26].mxu0  ;;  %1691 = vmatprep.subr.bf16.mxu1 %v1098_v18  ;;  %v1179_v24 = vld [vmem:[#allocation2] sm:$0xff] (!%p1649_p9) }
 0x1d6   : > { %v1031_v27 = vadd.f32 %v1766_v26, %v835_v22  ;;  %v1022_v28 = vpop.f32.mrb[27].mxu0  ;;  %1692 = vmatpush3.bf16.msra.mxu1 %v2266_v61  ;;  %v1076_v38 = vmax.f32 %v1028_v23, 0.0  ;;  %v1936_v22 = vmov (!%p1649_p9), 0.0   ;;  %v1867_v23 = vld [vmem:[%s2068_s26 + $0x8] sm:$0xff] (!%p1649_p9)  }
 0x1d7   : > { %v1023_v29 = vadd.f32 %v1022_v28, %v833_v25  ;;  %1693 = vmatprep.subr.bf16.mxu1 %v1099_v13  ;;  %v1074_v31 = vmax.f32 %v1020_v42, 0.0  ;;  %1771 = vmatprep.subr.bf16.mxu0 (!%p1649_p9), %v1936_v22  ;;  %v1180_v25 = vld [vmem:[#allocation2 + $0x8] sm:$0xff] (!%p1649_p9)  ;;  %v1868_v28 = vld [vmem:[%s2083_s24] sm:$0xff] (!%p1649_p9)  }
 0x1d8   : > { %v1077_v30 = vmax.f32 %v1031_v27, 0.0  ;;  %1772 = vmatpush3.bf16.msra.mxu0 (!%p1649_p9), %v1866_v21  ;;  %1775 = vmatprep.mubr.msk.bf16.mxu0 (!%p1649_p9), %vm1937_vm8, %v1936_v22  ;;  %v1181_v27 = vld [vmem:[#allocation2 + $0x10] sm:$0xff] (!%p1649_p9) }
 0x1d9   : > { %v1075_v32 = vmax.f32 %v1023_v29, 0.0  ;;  %1773 = vmatprep.subr.bf16.mxu0 (!%p1649_p9), %v1936_v22  ;;  %v1182_v29 = vld [vmem:[#allocation2 + $0x18] sm:$0xff] (!%p1649_p9) }
 0x1da   : > { %v1101_v35 = vpack.c.bf16 %v1077_v30, %v1076_v38  ;;  %1694 = vmatpush3.bf16.msra.mxu1 %v2263_v59  ;;  %v1185_v38 = vstv (!%p1649_p9), %s1178_s16  ;;  %v1869_v30 = vld [vmem:[%s2083_s24 + $0x8] sm:$0xff] (!%p1649_p9)  }
 0x1db   : > { %v1100_v39 = vpack.c.bf16 %v1075_v32, %v1074_v31  ;;  %v1769_v40 = vpop.f32.mrb[28].mxu0  ;;  %v1186_v31 = vmul.f32 (!%p1649_p9), %v1185_v38, %v1179_v24  ;;  %v1187_v32 = vmul.f32 (!%p1649_p9), %v1185_v38, %v1180_v25 }
 0x1dc   : > { %v1044_v43 = vadd.f32 %v1769_v40, %v838_v33  ;;  %v1035_v44 = vpop.f32.mrb[29].mxu0  ;;  %1774 = vmatpush3.bf16.msra.mxu0 (!%p1649_p9), %v1867_v23 }
 0x1dd   : > { %v1036_v46 = vadd.f32 %v1035_v44, %v836_v37  ;;  %v1770_v61 = vpop.f32.mrb[30].mxu0  ;;  %1695 = vmatprep.subr.bf16.mxu1 %v1100_v39  ;;  %v1188_v37 = vmul.f32 (!%p1649_p9), %v1185_v38, %v1181_v27  ;;  %v1189_v39 = vmul.f32 (!%p1649_p9), %v1185_v38, %v1182_v29 }
 0x1de   : > { %v1047_v47 = vadd.f32 %v1770_v61, %v839_v41  ;;  %v1038_v48 = vpop.f32.mrb[31].mxu0  ;;  %1696 = vmatpush3.bf16.msra.mxu1 %v2274_v14  ;;  %v1080_v52 = vmax.f32 %v1044_v43, 0.0  ;;  %v1082_v14 = vld [vmem:[#allocation3] sm:$0xff]  ;;  %v1184_v61 = vld [vmem:[#allocation2 + $0x28] sm:$0xff] (!%p1649_p9) }
 0x1df   : > { %v1039_v51 = vadd.f32 %v1038_v48, %v837_v45  ;;  %1697 = vmatprep.subr.bf16.mxu1 %v1101_v35  ;;  %v1078_v54 = vmax.f32 %v1036_v46, 0.0  ;;  %v1183_v46 = vld [vmem:[#allocation2 + $0x20] sm:$0xff] (!%p1649_p9) }
 0x1e0   : > { %v1081_v53 = vmax.f32 %v1047_v47, 0.0  ;;  %v1190_v48 = vmul.f32 (!%p1649_p9), %v1185_v38, %v1183_v46 }
 0x1e1   : > { %v1079_v59 = vmax.f32 %v1039_v51, 0.0  ;;  %v1191_v51 = vmul.f32 (!%p1649_p9), %v1185_v38, %v1184_v61 }
 0x1e2   : > { %v1103_v56 = vpack.c.bf16 %v1081_v53, %v1080_v52  ;;  %1698 = vmatpush3.bf16.msra.mxu1 %v2271_v12 }
 0x1e3   : > { %v1102_v57 = vpack.c.bf16 %v1079_v59, %v1078_v54 }
 0x1e5   : > { %1699 = vmatprep.subr.bf16.mxu1 %v1102_v57  ;;  %v1870_v57 = vld [vmem:[%s2083_s24 + $0x10] sm:$0xff] (!%p1649_p9)  }
 0x1e6   : > { %1700 = vmatpush3.bf16.msra.mxu1 %v2282_v36 }
 0x1e7   : > { %1701 = vmatprep.subr.bf16.mxu1 %v1103_v56 }
 0x1ea   : > { %1702 = vmatpush3.bf16.msra.mxu1 %v2279_v34 }
 0x1eb   : > { %1787 = vmatprep.subr.bf16.mxu1 (!%p1649_p9), %v1936_v22 }
 0x1ed   : > { %1640 = vmatmul.mubr.msk.bf16.vlgmr.msra.gmra.mrb[0].mxu1 %vm2230_vm6, %v1935_v55 }
 0x1ee   : > { %1642 = vmatprep.mubr.msk.bf16.mxu1 %vm2234_vm14, %v1935_v55  ;;  %1788 = vmatpush3.bf16.msra.mxu1 (!%p1649_p9), %v1868_v28 }
 0x1ef   : > { %1789 = vmatprep.subr.bf16.mxu1 (!%p1649_p9), %v1936_v22 }
 0x1f2   : > { %1790 = vmatpush3.bf16.msra.mxu1 (!%p1649_p9), %v1869_v30 }
 0x1f3   : > { %1791 = vmatprep.subr.bf16.mxu1 (!%p1649_p9), %v1936_v22 }
 0x1f5   : > { %1644 = vmatmul.mubr.msk.bf16.gmra.mrb[4].mxu1 %vm2238_vm15, %v1935_v55 }
 0x1f6   : > { %1646 = vmatprep.mubr.msk.bf16.mxu1 %vm2242_vm4, %v1935_v55  ;;  %1792 = vmatpush3.bf16.msra.mxu1 (!%p1649_p9), %v1870_v57 }
 0x1f7   : > { %1793 = vmatprep.subr.bf16.mxu1 (!%p1649_p9), %v1936_v22 }
 0x1fd   : > { %1648 = vmatmul.mubr.msk.bf16.gmra.mrb[8].mxu1 %vm2246_vm5, %v1935_v55 }
 0x1fe   : > { %1795 = vmatprep.mubr.msk.bf16.mxu1 (!%p1649_p9), %vm1937_vm8, %v1936_v22 }
 0x2c0   : > { %v1703_v12 = vpop.f32.mrb[0].mxu1 }
 0x2c1   : > { %v1704_v49 = vpop.f32.mrb[1].mxu1 }
 0x2c2   : > { %v1705_v34 = vadd.f32 %v1704_v49, %v1703_v12  ;;  %v1706_v36 = vpop.f32.mrb[2].mxu1  ;;  %v1871_v12 = vld [vmem:[%s2083_s24 + $0x18] sm:$0xff] (!%p1649_p9)  }
 0x2c3   : > { %v1707_v58 = vpop.f32.mrb[3].mxu1  ;;  %1794 = vmatpush3.bf16.msra.mxu1 (!%p1649_p9), %v1871_v12 }
 0x2c4   : > { %v1161_v60 = vadd.f32 %v1705_v34, %v1082_v14  ;;  %v1708_v62 = vadd.f32 %v1707_v58, %v1706_v36  ;;  %v1650_v14 = vld [vmem:[%s460_s17] ss:$0 sm:$0xff] (!%p1649_p9) }
 0x2c6   : > { %1168 = vst.msk [vmem:[#allocation3] sm:$0xff] %vm1167_vm7, %v1161_v60  ;;  %v1162_v16 = vadd.f32 %v1708_v62, %v1083_v15 }
 0x2c8   : > { %1169 = vst.msk [vmem:[#allocation3 + $0x8] sm:$0xff] %vm1167_vm7, %v1162_v16  ;;  %v1709_v19 = vpop.f32.mrb[4].mxu1 }
 0x2c9   : > { %v1710_v0 = vpop.f32.mrb[5].mxu1 }
 0x2ca   : > { %v1711_v20 = vadd.f32 %v1710_v0, %v1709_v19  ;;  %v1712_v55 = vpop.f32.mrb[6].mxu1 }
 0x2cb   : > { %v1713_v2 = vpop.f32.mrb[7].mxu1 }
 0x2cc   : > { %v1163_v3 = vadd.f32 %v1711_v20, %v1084_v63  ;;  %v1714_v4 = vadd.f32 %v1713_v2, %v1712_v55 }
 0x2cd   : > { %v1192_v42 = vld [vmem:[#allocation3] sm:$0xff] (!%p1649_p9) }
 0x2ce   : > { %1170 = vst.msk [vmem:[#allocation3 + $0x10] sm:$0xff] %vm1167_vm7, %v1163_v3  ;;  %v1164_v5 = vadd.f32 %v1714_v4, %v1085_v1  ;;  %v1198_v33 = vadd.f32 (!%p1649_p9), %v1192_v42, %v1186_v31 }
 0x2cf   : > { %v1193_v26 = vld [vmem:[#allocation3 + $0x8] sm:$0xff] (!%p1649_p9) }
 0x2d0   : > { %1171 = vst.msk [vmem:[#allocation3 + $0x18] sm:$0xff] %vm1167_vm7, %v1164_v5  ;;  %v1715_v6 = vpop.f32.mrb[8].mxu1  ;;  %v1199_v35 = vadd.f32 (!%p1649_p9), %v1193_v26, %v1187_v32 }
 0x2d1   : > { %v1716_v8 = vpop.f32.mrb[9].mxu1 }
 0x2d2   : > { %v1717_v9 = vadd.f32 %v1716_v8, %v1715_v6  ;;  %v1718_v10 = vpop.f32.mrb[10].mxu1  ;;  %1177 = sbr.rel (%p1649_p9) target bundleno = 1180 (0x49c), region = 72  ;;  %v1204_v43 = vpack.c.bf16 (!%p1649_p9), %v1199_v35, %v1198_v33 }
 0x2d3   : > { %v1719_v50 = vpop.f32.mrb[11].mxu1 }
 0x2d4   : > { %v1165_v13 = vadd.f32 %v1717_v9, %v1086_v7  ;;  %v1720_v17 = vadd.f32 %v1719_v50, %v1718_v10  ;;  %1776 = vmatmul.mubr.msk.bf16.vlgmr.msra.gmra.mrb[0].mxu0 (!%p1649_p9), %vm1167_vm7, %v1204_v43 }
 0x2d5   : > { %v1194_v40 = vld [vmem:[#allocation3 + $0x10] sm:$0xff] (!%p1649_p9)  ;;  %1779 = vmatprep.mubr.msk.bf16.mxu0 (!%p1649_p9), %vm1937_vm8, %v1936_v22 }
 0x2d6   : > { %1172 = vst.msk [vmem:[#allocation3 + $0x20] sm:$0xff] %vm1167_vm7, %v1165_v13  ;;  %v1166_v18 = vadd.f32 %v1720_v17, %v1087_v11  ;;  %v1200_v44 = vadd.f32 (!%p1649_p9), %v1194_v40, %v1188_v37 }
 0x2d7   : > { %v1195_v41 = vld [vmem:[#allocation3 + $0x18] sm:$0xff] (!%p1649_p9) }
 0x2d8   : > { %1173 = vst.msk [vmem:[#allocation3 + $0x28] sm:$0xff] %vm1167_vm7, %v1166_v18  ;;  %v1201_v45 = vadd.f32 (!%p1649_p9), %v1195_v41, %v1189_v39  ;;  %v1656_v18 = vld [vmem:[%s468_s21] ss:$0 sm:$0xff] (!%p1649_p9) }
 0x2d9   : > { %s1418_s26 = scalar_select %p1411_p10, 1, 0 }
 0x2da   : > { %v1205_v47 = vpack.c.bf16 %v1201_v45, %v1200_v44 }
 0x2db   : > { %v1419_v21 = vstv %s1418_s26 }
 0x2dc   : > { %1780 = vmatmul.mubr.msk.bf16.gmra.mrb[4].mxu0 %vm1167_vm7, %v1205_v47  ;;  %vm2370_vm6 = vcmp.eq.s32.totalorder %v1419_v21, 1 }
 0x2dd   : > { %v1196_v52 = vld [vmem:[#allocation3 + $0x20] sm:$0xff]  ;;  %1783 = vmatprep.mubr.msk.bf16.mxu0 %vm1937_vm8, %v1936_v22 }
 0x2de   : > { %v1202_v54 = vadd.f32 %v1196_v52, %v1190_v48 }
 0x2df   : > { %v1197_v53 = vld [vmem:[#allocation3 + $0x28] sm:$0xff] }
 0x2e0   : > { %v1203_v59 = vadd.f32 %v1197_v53, %v1191_v51 }
 0x2e2   : > { %v1206_v56 = vpack.c.bf16 %v1203_v59, %v1202_v54 }
 0x2e4   : > { %1784 = vmatmul.mubr.msk.bf16.gmra.mrb[8].mxu0 %vm1167_vm7, %v1206_v56 }
 0x3a7   : > { %v1273_v49 = vpop.f32.mrb[0].mxu0 }
 0x3a8   : > { %v1274_v34 = vadd.f32 %v1650_v14, %v1273_v49  ;;  %v1777_v36 = vpop.f32.mrb[1].mxu0 }
 0x3a9   : > { %v1276_v15 = vpop.f32.mrb[2].mxu0 }
 0x3aa   : > { %v1277_v58 = vadd.f32 %v1650_v14, %v1276_v15  ;;  %v1778_v60 = vpop.f32.mrb[3].mxu0  ;;  %v1296_v62 = vmax.f32 %v1274_v34, 0.0 }
 0x3ac   : > { %v1297_v16 = vmax.f32 %v1277_v58, 0.0 }
 0x3ae   : > { %v1302_v19 = vpack.c.bf16 %v1297_v16, %v1296_v62 }
 0x3af   : > { %v1281_v63 = vpop.f32.mrb[4].mxu0 }
 0x3b0   : > { %v1282_v0 = vadd.f32 %v1650_v14, %v1281_v63  ;;  %v1781_v20 = vpop.f32.mrb[5].mxu0  ;;  %1796 = vmatmul.mubr.msk.bf16.vlgmr.msra.gmra.mrb[0].mxu1 %vm1344_vm9, %v1302_v19 }
 0x3b1   : > { %v1284_v55 = vpop.f32.mrb[6].mxu0  ;;  %1799 = vmatprep.mubr.msk.bf16.mxu1 %vm1937_vm8, %v1936_v22 }
 0x3b2   : > { %v1285_v1 = vadd.f32 %v1650_v14, %v1284_v55  ;;  %v1782_v2 = vpop.f32.mrb[7].mxu0  ;;  %v1298_v3 = vmax.f32 %v1282_v0, 0.0 }
 0x3b4   : > { %v1299_v4 = vmax.f32 %v1285_v1, 0.0 }
 0x3b6   : > { %v1303_v5 = vpack.c.bf16 %v1299_v4, %v1298_v3 }
 0x3b7   : > { %v1289_v6 = vpop.f32.mrb[8].mxu0 }
 0x3b8   : > { %v1290_v7 = vadd.f32 %v1650_v14, %v1289_v6  ;;  %v1785_v8 = vpop.f32.mrb[9].mxu0  ;;  %1800 = vmatmul.mubr.msk.bf16.gmra.mrb[4].mxu1 %vm1344_vm9, %v1303_v5 }
 0x3b9   : > { %v1292_v9 = vpop.f32.mrb[10].mxu0  ;;  %1803 = vmatprep.mubr.msk.bf16.mxu1 %vm1937_vm8, %v1936_v22 }
 0x3ba   : > { %v1293_v10 = vadd.f32 %v1650_v14, %v1292_v9  ;;  %v1786_v11 = vpop.f32.mrb[11].mxu0  ;;  %v1300_v50 = vmax.f32 %v1290_v7, 0.0 }
 0x3bc   : > { %v1301_v13 = vmax.f32 %v1293_v10, 0.0 }
 0x3be   : > { %v1304_v17 = vpack.c.bf16 %v1301_v13, %v1300_v50 }
 0x3c0   : > { %1804 = vmatmul.mubr.msk.bf16.gmra.mrb[8].mxu1 %vm1344_vm9, %v1304_v17 }
 0x483   : > { %v1388_v23 = vpop.f32.mrb[0].mxu1 }
 0x484   : > { %v1389_v24 = vadd.f32 %v1656_v18, %v1388_v23  ;;  %v1797_v25 = vpop.f32.mrb[1].mxu1 }
 0x485   : > { %v1391_v42 = vpop.f32.mrb[2].mxu1 }
 0x486   : > { %v1412_v26 = vmax.f32 %v1389_v24, 0.0  ;;  %v1392_v27 = vadd.f32 %v1656_v18, %v1391_v42  ;;  %v1798_v28 = vpop.f32.mrb[3].mxu1 }
 0x488   : > { %v1421_v29 = vsel %vm2370_vm6, %v1389_v24, %v1412_v26  ;;  %v1413_v38 = vmax.f32 %v1392_v27, 0.0 }
 0x489   : > { %1427 = vst.msk [vmem:[#allocation2] sm:$0xff] %vm1167_vm7, %v1421_v29  ;;  %1433 = vst.msk [vmem:[%s2440_s9] sm:$0xff] %vm1167_vm7, %v1421_v29 }
 0x48a   : > { %v1422_v30 = vsel %vm2370_vm6, %v1392_v27, %v1413_v38 }
 0x48b   : > { %1428 = vst.msk [vmem:[#allocation2 + $0x8] sm:$0xff] %vm1167_vm7, %v1422_v30  ;;  %1434 = vst.msk [vmem:[%s2440_s9 + $0x8] sm:$0xff] %vm1167_vm7, %v1422_v30  ;;  %v1396_v31 = vpop.f32.mrb[4].mxu1 }
 0x48c   : > { %v1397_v32 = vadd.f32 %v1656_v18, %v1396_v31  ;;  %v1801_v33 = vpop.f32.mrb[5].mxu1 }
 0x48d   : > { %v1399_v35 = vpop.f32.mrb[6].mxu1 }
 0x48e   : > { %v1414_v37 = vmax.f32 %v1397_v32, 0.0  ;;  %v1400_v39 = vadd.f32 %v1656_v18, %v1399_v35  ;;  %v1802_v40 = vpop.f32.mrb[7].mxu1 }
 0x490   : > { %v1423_v41 = vsel %vm2370_vm6, %v1397_v32, %v1414_v37  ;;  %v1415_v43 = vmax.f32 %v1400_v39, 0.0 }
 0x491   : > { %1429 = vst.msk [vmem:[#allocation2 + $0x10] sm:$0xff] %vm1167_vm7, %v1423_v41  ;;  %1435 = vst.msk [vmem:[%s2440_s9 + $0x10] sm:$0xff] %vm1167_vm7, %v1423_v41 }
 0x492   : > { %v1424_v44 = vsel %vm2370_vm6, %v1400_v39, %v1415_v43 }
 0x493   : > { %1430 = vst.msk [vmem:[#allocation2 + $0x18] sm:$0xff] %vm1167_vm7, %v1424_v44  ;;  %1436 = vst.msk [vmem:[%s2440_s9 + $0x18] sm:$0xff] %vm1167_vm7, %v1424_v44  ;;  %v1404_v45 = vpop.f32.mrb[8].mxu1 }
 0x494   : > { %v1405_v46 = vadd.f32 %v1656_v18, %v1404_v45  ;;  %v1805_v61 = vpop.f32.mrb[9].mxu1 }
 0x495   : > { %v1407_v47 = vpop.f32.mrb[10].mxu1 }
 0x496   : > { %v1416_v48 = vmax.f32 %v1405_v46, 0.0  ;;  %v1408_v51 = vadd.f32 %v1656_v18, %v1407_v47  ;;  %v1806_v52 = vpop.f32.mrb[11].mxu1 }
 0x498   : > { %v1425_v53 = vsel %vm2370_vm6, %v1405_v46, %v1416_v48  ;;  %v1417_v54 = vmax.f32 %v1408_v51, 0.0 }
 0x499   : > { %1431 = vst.msk [vmem:[#allocation2 + $0x20] sm:$0xff] %vm1167_vm7, %v1425_v53  ;;  %1437 = vst.msk [vmem:[%s2440_s9 + $0x20] sm:$0xff] %vm1167_vm7, %v1425_v53 }
 0x49a   : > { %v1426_v59 = vsel %vm2370_vm6, %v1408_v51, %v1417_v54 }
 0x49b   : > { %1432 = vst.msk [vmem:[#allocation2 + $0x28] sm:$0xff] %vm1167_vm7, %v1426_v59  ;;  %1438 = vst.msk [vmem:[%s2440_s9 + $0x28] sm:$0xff] %vm1167_vm7, %v1426_v59 }
 0x49c PF: > { %s20_s13 = sadd.s32 1, %s1929_s13   ;;  %s2466_s30 = sld [smem:[#allocation7_spill]] }
 0x49d   : > { %p17_p11 = scmp.ge.s32.totalorder %s20_s13, 6   ;;  %s2467_s10 = sld [smem:[#allocation8_spill]] }
 0x49e   : > { %s2468_s11 = sld [smem:[#allocation9_spill]]  ;;  %s2469_s12 = sld [smem:[#allocation10_spill]] }
 0x49f   :  { %19 = sbr.rel (!%p17_p11) target bundleno = 6 (0x6), region = 117 }
 0x4a6   :  { %1450 = vsyncpa [#allocation5], 1 }
 0x4a7   :  { %1452 = vsyncpa [#allocation5 + $0x1], 1 }

</bundles_post_ra>
